<compile_context>
chip_gen: v5e
topology: v5e:2x2
jax: 0.10.0
libtpu: 0.0.40
codegen_flags: <defaults>
</compile_context>

<pallas_src>
import jax
import jax.numpy as jnp
from jax.experimental import pallas as pl
from jax.experimental.pallas import tpu as pltpu

IGNORE_INDEX = -100
LANE = 128  # TPU vreg lane width: keep every last dim 128-dense


def _round_up(x, m):
    return ((x + m - 1) // m) * m


# ----------------------------- Pallas kernel --------------------------------
def _gnn_layer_kernel(a_ref, h0_ref, m_ref, w_ref, b_ref, o_ref, h_scr):
    """One GCN layer per grid step; weights streamed, A/h0/pool-vec resident.

    a_ref : [N_pad, N_pad]     bf16  normalized adjacency (VMEM-resident)
    h0_ref: [N_pad, D_pad]     bf16  node features        (VMEM-resident)
    m_ref : [1, N_pad]         bf16  row_mask / num_nodes pooling vector
    w_ref : [1, D_pad, D_pad]  bf16  this layer's weight (streamed per step)
    b_ref : [1, 1, D_pad]      f32   this layer's bias   (streamed per step)
    o_ref : [1, D_pad]         f32   pooled graph token (the only HBM write)
    h_scr : [2, N_pad, D_pad]  bf16  ping-pong activation scratch
    """
    l = pl.program_id(0)
    last = pl.num_programs(0) - 1

    @pl.when(l == 0)
    def _():
        h_scr[1] = h0_ref[...]          # seed the ping-pong buffer with x

    a = a_ref[...]
    src = h_scr[(l + 1) & 1]            # previous layer's activations (bf16)
    w = w_ref[0]
    b = b_ref[0]

    @pl.when(l < last)
    def _():
        # hidden layers: H' = relu(A_hat @ (H @ W) + b), stored as bf16
        hw = jnp.dot(src, w, preferred_element_type=jnp.float32)
        out = jnp.dot(a, hw.astype(jnp.bfloat16),
                      preferred_element_type=jnp.float32) + b
        h_scr[l & 1] = jnp.maximum(out, 0.0).astype(jnp.bfloat16)

    @pl.when(l == last)
    def _():
        # mean-pool folded into the (ReLU-free) last layer:
        #   pooled = ((m @ A) @ H) @ W + b,   sum(m) == 1 over real rows only,
        # so padded rows (which hold broadcast bias from earlier layers) and
        # padded columns (zero) can never leak into the mean.
        ma = jnp.dot(m_ref[...], a, preferred_element_type=jnp.float32)
        mah = jnp.dot(ma.astype(jnp.bfloat16), src,
                      preferred_element_type=jnp.float32)
        o_ref[...] = jnp.dot(mah.astype(jnp.bfloat16), w,
                             preferred_element_type=jnp.float32) + b


def fused_gnn_pool(a_hat, x, w_stack, b_stack, out_dim):
    """relu-GCN stack + node mean-pool; layer-streamed single pallas_call."""
    n = x.shape[0]
    n_layers, d_pad, _ = w_stack.shape
    n_pad = _round_up(max(n, LANE), LANE)  # lane-dense adjacency / activations

    # cast to bf16 BEFORE padding (half the host->kernel HBM bytes for A/h0)
    a_pad = jnp.pad(a_hat.astype(jnp.bfloat16),
                    ((0, n_pad - n), (0, n_pad - n)))
    h0_pad = jnp.pad(x.astype(jnp.bfloat16),
                     ((0, n_pad - n), (0, d_pad - x.shape[1])))
    # pooling vector: 1/num_nodes on real rows, 0 on padded rows
    m_pad = jnp.zeros((1, n_pad), jnp.float32).at[0, :n].set(1.0 / n)
    m_pad = m_pad.astype(jnp.bfloat16)

    # Explicit VMEM budget (A + h0 + m + out, 2x double-buffered W/b tiles,
    # 2x bf16 activation scratch) so behaviour is identical across the
    # v5e 16 MiB / v6e 32 MiB scoped-VMEM defaults and v7x's 64 MiB physical.
    resident = (n_pad * n_pad * 2            # A_hat (bf16)
                + n_pad * d_pad * 2          # h0    (bf16)
                + n_pad * 2 + d_pad * 4      # m + pooled out
                + 2 * (d_pad * d_pad * 2 + d_pad * 4)   # streamed W/b x2 bufs
                + 2 * n_pad * d_pad * 2)     # ping-pong activations (bf16)
    vmem_limit = min(max(int(1.5 * resident) + (2 << 20), 32 << 20), 64 << 20)

    out = pl.pallas_call(
        _gnn_layer_kernel,
        out_shape=jax.ShapeDtypeStruct((1, d_pad), jnp.float32),
        grid=(n_layers,),
        in_specs=[
            pl.BlockSpec((n_pad, n_pad), lambda l: (0, 0)),        # A: resident
            pl.BlockSpec((n_pad, d_pad), lambda l: (0, 0)),        # h0: resident
            pl.BlockSpec((1, n_pad), lambda l: (0, 0)),            # m: resident
            pl.BlockSpec((1, d_pad, d_pad), lambda l: (l, 0, 0)),  # W_l: streamed
            pl.BlockSpec((1, 1, d_pad), lambda l: (l, 0, 0)),      # b_l: streamed
        ],
        out_specs=pl.BlockSpec((1, d_pad), lambda l: (0, 0)),
        scratch_shapes=[pltpu.VMEM((2, n_pad, d_pad), jnp.bfloat16)],
        compiler_params=pltpu.CompilerParams(
            dimension_semantics=("arbitrary",),   # layer axis is sequential
            vmem_limit_bytes=vmem_limit),
    )(a_pad, h0_pad, m_pad, w_stack, b_stack)
    return out[:, :out_dim]


def gnn_pool_reference(a_hat, x, w_stack, b_stack, out_dim):
    """Pure-JAX mirror (unfused pool) of the kernel's mixed-precision GCN."""
    n_layers, d_pad, _ = w_stack.shape
    a_bf = a_hat.astype(jnp.bfloat16)
    h = jnp.pad(x, ((0, 0), (0, d_pad - x.shape[1]))).astype(jnp.bfloat16)
    out = None
    for l in range(n_layers):
        hw = jnp.dot(h, w_stack[l], preferred_element_type=jnp.float32)
        out = jnp.dot(a_bf, hw.astype(jnp.bfloat16),
                      preferred_element_type=jnp.float32) + b_stack[l]
        if l < n_layers - 1:
            h = jnp.maximum(out, 0.0).astype(jnp.bfloat16)
    pooled = jnp.mean(out, axis=0, keepdims=True)
    return pooled[:, :out_dim]


# ------------------------------- JAX glue -----------------------------------
def build_normalized_adjacency(edge_index, num_nodes):
    """GCN A_hat with self-loops, built via one-hot matmuls (no dense scatter)."""
    src, dst = edge_index[0], edge_index[1]
    src_oh = jax.nn.one_hot(src, num_nodes, dtype=jnp.float32)  # [E, N]
    dst_oh = jax.nn.one_hot(dst, num_nodes, dtype=jnp.float32)  # [E, N]
    counts = dst_oh.T @ src_oh                                  # a[dst, src] += 1
    a = jnp.minimum(counts + counts.T + jnp.eye(num_nodes, dtype=jnp.float32), 1.0)
    deg = jnp.sum(a, axis=1)
    d_inv_sqrt = jax.lax.rsqrt(deg)  # safe: self-loops guarantee deg >= 1
    return a * d_inv_sqrt[:, None] * d_inv_sqrt[None, :]


def encode_task_graph(params, x, edge_index, batch_size):
    a_hat = build_normalized_adjacency(edge_index, x.shape[0])
    graph_embed = fused_gnn_pool(a_hat, x, params["gnn_w_stack"],
                                 params["gnn_b_stack"], params["gnn_out_dim"])
    return jnp.tile(graph_embed, (batch_size, 1))  # .repeat(batch_size, 1)


def graphtoken_forward(params, samples, task_graph, cfg):
    emb = params["word_embedding"]                 # [V, D]
    bos_ids = list(cfg["bos_ids"])
    pad_id = cfg["pad_id"]
    batch_size = len(samples["id"])

    graph_embeds = encode_task_graph(
        params, task_graph["x"], task_graph["edge_index"], batch_size)  # [B, D]

    # ---- host-side ragged id assembly (mirrors the tokenizer-list loop) ----
    seq_ids, label_lists = [], []
    for i in range(batch_size):
        label_ids = samples["label_ids"][i][: cfg["max_new_tokens"]] + cfg["eos_ids"]
        input_ids = (samples["request_ids"][i][: cfg["max_txt_len"]]
                     + cfg["eos_user_ids"] + label_ids)
        # graph-token slot uses pad_id as a placeholder; overwritten below
        seq_ids.append(bos_ids + [pad_id] + input_ids)
        label_lists.append(label_ids)

    max_length = max(len(s) for s in seq_ids)
    id_rows, attn_rows, label_rows, graph_pos = [], [], [], []
    for i in range(batch_size):
        p = max_length - len(seq_ids[i])           # left padding (padding_side='left')
        id_rows.append([pad_id] * p + seq_ids[i])
        attn_rows.append([0] * p + [1] * len(seq_ids[i]))
        label_rows.append([IGNORE_INDEX] * (max_length - len(label_lists[i]))
                          + label_lists[i])
        graph_pos.append(p + len(bos_ids))

    id_matrix = jnp.array(id_rows, jnp.int32)           # [B, T]
    attention_mask = jnp.array(attn_rows, jnp.int32)    # [B, T]
    label_input_ids = jnp.array(label_rows, jnp.int32)  # [B, T]
    graph_pos = jnp.array(graph_pos, jnp.int32)         # [B]

    # one batched embedding gather + one where() to insert the graph token
    input_embeds = jnp.take(emb, id_matrix, axis=0)     # [B, T, D]
    is_graph = (jnp.arange(max_length, dtype=jnp.int32)[None, :]
                == graph_pos[:, None])[..., None]       # [B, T, 1]
    input_embeds = jnp.where(is_graph, graph_embeds[:, None, :], input_embeds)

    # TODO(synk): outputs = self.model(inputs_embeds=..., labels=...) -> loss
    # (frozen pretrained causal LM + cross-entropy) is not reproduced; return
    # the assembled LLM inputs instead.
    return input_embeds, attention_mask, label_input_ids, graph_embeds


# --------------------------- deterministic init ------------------------------
def init_params(key, gnn_in_dim, gnn_hidden_dim, gnn_output_dim, n_layers,
                vocab_size, d_model):
    assert gnn_output_dim == d_model, "graph token must match LLM hidden size"
    dims = [gnn_in_dim] + [gnn_hidden_dim] * (n_layers - 1) + [gnn_output_dim]
    d_pad = _round_up(max(dims), LANE)  # lane-dense, zero-padded feature dims
    keys = jax.random.split(key, n_layers + 1)

    w_stack = jnp.zeros((n_layers, d_pad, d_pad), jnp.float32)
    b_stack = jnp.zeros((n_layers, 1, d_pad), jnp.float32)
    for li in range(n_layers):
        fan_in = dims[li]
        w = (jax.random.normal(keys[li], (dims[li], dims[li + 1]), jnp.float32)
             / jnp.sqrt(jnp.float32(fan_in)))
        w_stack = w_stack.at[li, :dims[li], :dims[li + 1]].set(w)
        # biases start at zero; zero padding keeps padded channels inert

    word_embedding = 0.02 * jax.random.normal(
        keys[-1], (vocab_size, d_model), jnp.float32)
    return {
        "gnn_w_stack": w_stack.astype(jnp.bfloat16),  # bf16 MXU inputs
        "gnn_b_stack": b_stack,                       # f32 (added to f32 acc)
        "gnn_out_dim": gnn_output_dim,
        "word_embedding": word_embedding,
    }


# ---------------------------------- main -------------------------------------
if __name__ == "__main__":
    key = jax.random.PRNGKey(0)
    k_graph, k_edges, k_params = jax.random.split(key, 3)

    # small, forward-consistent shapes
    num_nodes = 16
    gnn_in_dim, gnn_hidden_dim, gnn_output_dim, n_layers = 32, 64, 128, 2
    vocab_size, d_model = 256, 128
    cfg = dict(
        max_txt_len=8,
        max_new_tokens=4,
        bos_ids=[1, 5, 6],        # '<s>[INST]'
        eos_ids=[2],              # '</s>'
        eos_user_ids=[7, 8],      # '[/INST]'
        pad_id=0,
    )

    params = init_params(k_params, gnn_in_dim, gnn_hidden_dim, gnn_output_dim,
                         n_layers, vocab_size, d_model)

    # task graph: node features + random undirected edges
    x = jax.random.normal(k_graph, (num_nodes, gnn_in_dim), jnp.float32)
    edge_index = jax.random.randint(k_edges, (2, 24), 0, num_nodes, jnp.int32)
    task_graph = {"x": x, "edge_index": edge_index}

    # tokenized samples (tokenizer itself is out of scope; ids are synthetic)
    samples = {
        "id": [0, 1],
        "request_ids": [[3, 4, 5, 6, 9, 10, 11, 12, 13, 14], [15, 16, 17]],
        "label_ids": [[20, 21, 22, 23, 24, 25], [30, 31]],
    }

    input_embeds, attention_mask, label_input_ids, graph_embeds = \
        graphtoken_forward(params, samples, task_graph, cfg)

    jax.block_until_ready((input_embeds, attention_mask, label_input_ids, graph_embeds))

    # shape checks
    assert input_embeds.shape[0] == 2 and input_embeds.shape[2] == d_model
    assert attention_mask.shape == input_embeds.shape[:2]
    assert label_input_ids.shape == input_embeds.shape[:2]
    assert graph_embeds.shape == (2, gnn_output_dim)

    # numeric check vs pure-JAX mixed-precision reference (unfused pool order;
    # differences come only from bf16 intermediate truncation points)
    a_hat = build_normalized_adjacency(edge_index, num_nodes)
    ref = gnn_pool_reference(a_hat, x, params["gnn_w_stack"],
                             params["gnn_b_stack"], gnn_output_dim)
    assert bool(jnp.allclose(graph_embeds[0], ref[0], rtol=5e-2, atol=5e-2)), \
        "graph token mismatch vs reference"
    assert bool(jnp.all(jnp.isfinite(graph_embeds)))

    print("KERNEL_OK")
</pallas_src>

<mosaic_0001>
module attributes {stable_mosaic.version = 11 : i64} {
  func.func @_gnn_layer_kernel(%arg0: i32, %arg1: memref<128x128xbf16, #tpu.memory_space<vmem>>, %arg2: memref<128x128xbf16, #tpu.memory_space<vmem>>, %arg3: memref<1x128xbf16, #tpu.memory_space<vmem>>, %arg4: memref<1x128x128xbf16, #tpu.memory_space<vmem>>, %arg5: memref<1x1x128xf32, #tpu.memory_space<vmem>>, %arg6: memref<1x128xf32, #tpu.memory_space<vmem>>, %arg7: memref<2x128x128xbf16, #tpu.memory_space<vmem>>) attributes {dimension_semantics = [#tpu.dimension_semantics<arbitrary>], iteration_bounds = array<i64: 2>, scalar_prefetch = 0 : i64, scratch_operands = 1 : i64, tpu.core_type = #tpu.core_type<tc>, window_params = [{pipeline_mode = #tpu.pipeline_mode<synchronous>, transform_indices = @transform_0, window_bounds = array<i64: 128, 128>}, {pipeline_mode = #tpu.pipeline_mode<synchronous>, transform_indices = @transform_1, window_bounds = array<i64: 128, 128>}, {pipeline_mode = #tpu.pipeline_mode<synchronous>, transform_indices = @transform_2, window_bounds = array<i64: 1, 128>}, {transform_indices = @transform_3, window_bounds = array<i64: 1, 128, 128>}, {transform_indices = @transform_4, window_bounds = array<i64: 1, 1, 128>}, {pipeline_mode = #tpu.pipeline_mode<synchronous>, transform_indices = @transform_5, window_bounds = array<i64: 1, 128>}]} {
    %c0_i32 = arith.constant 0 : i32
    %0 = arith.cmpi eq, %arg0, %c0_i32 : i32
    %1 = arith.extui %0 : i1 to i32
    %c0_i32_0 = arith.constant 0 : i32
    %2 = arith.cmpi ne, %1, %c0_i32_0 : i32
    scf.if %2 {
      %c0_15 = arith.constant 0 : index
      %c0_16 = arith.constant 0 : index
      %19 = vector.load %arg2[%c0_15, %c0_16] : memref<128x128xbf16, #tpu.memory_space<vmem>>, vector<128x128xbf16>
      %c1 = arith.constant 1 : index
      %c0_17 = arith.constant 0 : index
      %c0_18 = arith.constant 0 : index
      %20 = vector.load %arg7[%c1, %c0_17, %c0_18] : memref<2x128x128xbf16, #tpu.memory_space<vmem>>, vector<1x128x128xbf16>
      %21 = vector.shape_cast %20 : vector<1x128x128xbf16> to vector<128x128xbf16>
      %22 = vector.shape_cast %19 : vector<128x128xbf16> to vector<1x128x128xbf16>
      tpu.vector_store %arg7[%c1, %c0_17, %c0_18], %22 {strides = array<i32>} : memref<2x128x128xbf16, #tpu.memory_space<vmem>>, vector<1x128x128xbf16>,
    } else {
    }
    %c0 = arith.constant 0 : index
    %c0_1 = arith.constant 0 : index
    %3 = vector.load %arg1[%c0, %c0_1] : memref<128x128xbf16, #tpu.memory_space<vmem>>, vector<128x128xbf16>
    %c1_i32 = arith.constant 1 : i32
    %4 = arith.addi %arg0, %c1_i32 : i32
    %c1_i32_2 = arith.constant 1 : i32
    %5 = arith.andi %4, %c1_i32_2 : i32
    %6 = arith.index_cast %5 : i32 to index
    %c0_3 = arith.constant 0 : index
    %c0_4 = arith.constant 0 : index
    %7 = vector.load %arg7[%6, %c0_3, %c0_4] : memref<2x128x128xbf16, #tpu.memory_space<vmem>>, vector<1x128x128xbf16>
    %8 = vector.shape_cast %7 : vector<1x128x128xbf16> to vector<128x128xbf16>
    %c0_5 = arith.constant 0 : index
    %c0_6 = arith.constant 0 : index
    %c0_7 = arith.constant 0 : index
    %9 = vector.load %arg4[%c0_5, %c0_6, %c0_7] : memref<1x128x128xbf16, #tpu.memory_space<vmem>>, vector<1x128x128xbf16>
    %10 = vector.shape_cast %9 : vector<1x128x128xbf16> to vector<128x128xbf16>
    %c0_8 = arith.constant 0 : index
    %c0_9 = arith.constant 0 : index
    %c0_10 = arith.constant 0 : index
    %11 = vector.load %arg5[%c0_8, %c0_9, %c0_10] : memref<1x1x128xf32, #tpu.memory_space<vmem>>, vector<1x1x128xf32>
    %12 = vector.shape_cast %11 : vector<1x1x128xf32> to vector<1x128xf32>
    %c1_i32_11 = arith.constant 1 : i32
    %13 = arith.cmpi slt, %arg0, %c1_i32_11 : i32
    %14 = arith.extui %13 : i1 to i32
    %c0_i32_12 = arith.constant 0 : i32
    %15 = arith.cmpi ne, %14, %c0_i32_12 : i32
    scf.if %15 {
      %cst = arith.constant dense<0.000000e+00> : vector<128x128xf32>
      %19 = tpu.matmul %8, %10, %cst {dimension_numbers = #tpu.dot_dimension_numbers<[1], [0], [0], [1], [0, 0, 1, 1], [], []>} : vector<128x128xbf16>, vector<128x128xbf16>, vector<128x128xf32> -> vector<128x128xf32>
      %20 = arith.truncf %19 : vector<128x128xf32> to vector<128x128xbf16>
      %cst_15 = arith.constant dense<0.000000e+00> : vector<128x128xf32>
      %21 = tpu.matmul %3, %20, %cst_15 {dimension_numbers = #tpu.dot_dimension_numbers<[1], [0], [0], [1], [0, 0, 1, 1], [], []>} : vector<128x128xbf16>, vector<128x128xbf16>, vector<128x128xf32> -> vector<128x128xf32>
      %22 = vector.broadcast %12 : vector<1x128xf32> to vector<128x128xf32>
      %23 = arith.addf %21, %22 : vector<128x128xf32>
      %cst_16 = arith.constant 0.000000e+00 : f32
      %24 = vector.broadcast %cst_16 : f32 to vector<128x128xf32>
      %25 = arith.maximumf %23, %24 : vector<128x128xf32>
      %26 = arith.truncf %25 : vector<128x128xf32> to vector<128x128xbf16>
      %c1_i32_17 = arith.constant 1 : i32
      %27 = arith.andi %arg0, %c1_i32_17 : i32
      %28 = arith.index_cast %27 : i32 to index
      %c0_18 = arith.constant 0 : index
      %c0_19 = arith.constant 0 : index
      %29 = vector.load %arg7[%28, %c0_18, %c0_19] : memref<2x128x128xbf16, #tpu.memory_space<vmem>>, vector<1x128x128xbf16>
      %30 = vector.shape_cast %29 : vector<1x128x128xbf16> to vector<128x128xbf16>
      %31 = vector.shape_cast %26 : vector<128x128xbf16> to vector<1x128x128xbf16>
      tpu.vector_store %arg7[%28, %c0_18, %c0_19], %31 {strides = array<i32>} : memref<2x128x128xbf16, #tpu.memory_space<vmem>>, vector<1x128x128xbf16>,
    } else {
    }
    %c1_i32_13 = arith.constant 1 : i32
    %16 = arith.cmpi eq, %arg0, %c1_i32_13 : i32
    %17 = arith.extui %16 : i1 to i32
    %c0_i32_14 = arith.constant 0 : i32
    %18 = arith.cmpi ne, %17, %c0_i32_14 : i32
    scf.if %18 {
      %c0_15 = arith.constant 0 : index
      %c0_16 = arith.constant 0 : index
      %19 = vector.load %arg3[%c0_15, %c0_16] : memref<1x128xbf16, #tpu.memory_space<vmem>>, vector<1x128xbf16>
      %cst = arith.constant dense<0.000000e+00> : vector<1x128xf32>
      %20 = tpu.matmul %19, %3, %cst {dimension_numbers = #tpu.dot_dimension_numbers<[1], [0], [0], [1], [0, 0, 1, 1], [], []>} : vector<1x128xbf16>, vector<128x128xbf16>, vector<1x128xf32> -> vector<1x128xf32>
      %21 = arith.truncf %20 : vector<1x128xf32> to vector<1x128xbf16>
      %cst_17 = arith.constant dense<0.000000e+00> : vector<1x128xf32>
      %22 = tpu.matmul %21, %8, %cst_17 {dimension_numbers = #tpu.dot_dimension_numbers<[1], [0], [0], [1], [0, 0, 1, 1], [], []>} : vector<1x128xbf16>, vector<128x128xbf16>, vector<1x128xf32> -> vector<1x128xf32>
      %23 = arith.truncf %22 : vector<1x128xf32> to vector<1x128xbf16>
      %cst_18 = arith.constant dense<0.000000e+00> : vector<1x128xf32>
      %24 = tpu.matmul %23, %10, %cst_18 {dimension_numbers = #tpu.dot_dimension_numbers<[1], [0], [0], [1], [0, 0, 1, 1], [], []>} : vector<1x128xbf16>, vector<128x128xbf16>, vector<1x128xf32> -> vector<1x128xf32>
      %25 = arith.addf %24, %12 : vector<1x128xf32>
      %c0_19 = arith.constant 0 : index
      %c0_20 = arith.constant 0 : index
      %26 = vector.load %arg6[%c0_19, %c0_20] : memref<1x128xf32, #tpu.memory_space<vmem>>, vector<1x128xf32>
      tpu.vector_store %arg6[%c0_19, %c0_20], %25 {strides = array<i32>} : memref<1x128xf32, #tpu.memory_space<vmem>>, vector<1x128xf32>,
    } else {
    }
    return
  }
  func.func @transform_0(%arg0: i32) -> (i32, i32) {
    %c0_i32 = arith.constant 0 : i32
    %c0_i32_0 = arith.constant 0 : i32
    %c0_i32_1 = arith.constant 0 : i32
    return %c0_i32, %c0_i32_0 : i32, i32
  }
  func.func @transform_1(%arg0: i32) -> (i32, i32) {
    %c0_i32 = arith.constant 0 : i32
    %c0_i32_0 = arith.constant 0 : i32
    %c0_i32_1 = arith.constant 0 : i32
    return %c0_i32, %c0_i32_0 : i32, i32
  }
  func.func @transform_2(%arg0: i32) -> (i32, i32) {
    %c0_i32 = arith.constant 0 : i32
    %c0_i32_0 = arith.constant 0 : i32
    %c0_i32_1 = arith.constant 0 : i32
    return %c0_i32, %c0_i32_0 : i32, i32
  }
  func.func @transform_3(%arg0: i32) -> (i32, i32, i32) {
    %c0_i32 = arith.constant 0 : i32
    %c0_i32_0 = arith.constant 0 : i32
    %c0_i32_1 = arith.constant 0 : i32
    return %arg0, %c0_i32, %c0_i32_0 : i32, i32, i32
  }
  func.func @transform_4(%arg0: i32) -> (i32, i32, i32) {
    %c0_i32 = arith.constant 0 : i32
    %c0_i32_0 = arith.constant 0 : i32
    %c0_i32_1 = arith.constant 0 : i32
    return %arg0, %c0_i32, %c0_i32_0 : i32, i32, i32
  }
  func.func @transform_5(%arg0: i32) -> (i32, i32) {
    %c0_i32 = arith.constant 0 : i32
    %c0_i32_0 = arith.constant 0 : i32
    %c0_i32_1 = arith.constant 0 : i32
    return %c0_i32, %c0_i32_0 : i32, i32
  }
}

</mosaic_0001>

<bundles_post_ra>
// kernel: tpu_custom_call.1
= control target key start
LH: loop header
LB: loop body
LE: loop exit
PB: predicated region body
PF: predicated region fallthrough
CT: control target
= control target key end

     0   :  { %10 = vsyncpa [#allocation4], 0  ;;  %s2038_s0 = inlined_call_operand.hbm [shape: bf16[128,128], index: 0, kind: input, shape index: {}]   ;;  %s2039_s1 = inlined_call_operand.hbm [shape: bf16[128,128], index: 1, kind: input, shape index: {}]   ;;  %s2040_s2 = inlined_call_operand.vmem [shape: bf16[1,128], index: 2, kind: input, shape index: {}]   ;;  %s2041_s3 = inlined_call_operand.hbm [shape: bf16[2,128,128], index: 3, kind: input, shape index: {}]   ;;  %s2042_s4 = inlined_call_operand.vmem [shape: f32[2,1,128], index: 4, kind: input, shape index: {}]   ;;  %s2043_s5 = inlined_call_operand.hbm [shape: f32[1,128], index: 5, kind: output, shape index: {}]  }
   0x1   :  { %11 = vsyncpa [#allocation7], 0 }
   0x2   :  { %12 = vsyncpa [#allocation5], 0  ;;  %s1559_s18 = smov 0   ;;  %s1561_s19 = smov 0  }
   0x3   :  { %s1563_s20 = smov 0   ;;  %s1565_s21 = smov 0  }
   0x4 LB: > { %s1578_s22 = sadd.s32 4294967295, %s1522_s21   ;;  %p101_p0 = scmp.ne.s32.totalorder %s1514_s19, %s1510_s18  ;;  %s1522_s21 = sphi %s1565_s21, %s2130_s21   ;;  %s1518_s20 = sphi %s1563_s20, %s2129_s20   ;;  %s1514_s19 = sphi %s1561_s19, %s2128_s19   ;;  %s1510_s18 = sphi %s1559_s18, %s2127_s18  }
   0x5   : > { %p102_p1 = scmp.eq.s32.totalorder %s1578_s22, 0  ;;  %p961_p2 = scmp.ge.s32.totalorder %s1522_s21, 1 }
   0x6   : > { %p159_p3 = scmp.lt.s32.totalorder %s1522_s21, 3  ;;  %p962_p4 = scmp.ne.s32.totalorder %s1578_s22, 0 }
   0x7   : > { %p1587_p5 = por %p102_p1, %p101_p0  ;;  %s170_s26 = sshll.u32 %s2038_s0, 4  ;;  %s171_s26 = int_to_ptr.hbm [resolvable:$true] %s170_s26 }
   0x8   : > { %p1594_p6 = pnand %p961_p2, %p159_p3  ;;  %s1524_s28 = smov [#allocation3]  }
   0x9   : > { %s172_s29 = sshll.u32 %s1524_s28, 4  ;;  %s184_s7 = sshll.u32 %s2039_s1, 4  ;;  %s173_s29 = int_to_ptr.vmem [resolvable:$true] %s172_s29  ;;  %s185_s7 = int_to_ptr.hbm [resolvable:$true] %s184_s7 }
   0xa   : > { %p1303_p7 = pneg %p1594_p6  ;;  %s1525_s8 = smov 64  }
   0xb   : > { %s1526_s9 = smov 4   ;;  %s1527_s10 = smov [#allocation6]  }
   0xc   : > { %p1304_p8 = pnand %p1303_p7, %p102_p1  ;;  %s186_s11 = sshll.u32 %s1527_s10, 4  ;;  %s187_s11 = int_to_ptr.vmem [resolvable:$true] %s186_s11 }
   0xd   : > { %s1612_s12 = sadd.s32 1, %s1522_s21   ;;  %s88_s13 = sadd.s32 1, %s1518_s20 }
   0xe   : > { %1306 = dma.hbm_to_vmem [thread:$0]  (!%p1304_p8), %s171_s26, 1024, %s173_s29, [#allocation4], %s1525_s8, %s1525_s8, %s1526_s9  }
   0xf   : > { %1309 = dma.hbm_to_vmem [thread:$0]  (!%p1304_p8), %s185_s7, 1024, %s187_s11, [#allocation7], %s1525_s8, %s1525_s8, %s1526_s9  }
  0x10   : > { %s85_s14 = ssub.s32 %s1522_s21, %s1612_s12  ;;  %p95_p9 = scmp.ne.s32.totalorder %s1518_s20, %s1514_s19 }
  0x11   : > { %p86_p10 = scmp.eq.s32.totalorder %s85_s14, 0  ;;  %p96_p11 = scmp.eq.s32.totalorder %s1522_s21, 0 }
  0x12   : > { %p1316_p12 = scmp.lt.s32.totalorder %s1522_s21, 2  ;;  %s203_s15 = sand.u32 1, %s1522_s21  }
  0x13   : > { %s1623_s16 = scalar_select %p86_p10, %s1518_s20, %s88_s13  }
  0x14   : > { %p97_p13 = por %p96_p11, %p95_p9  ;;  %s205_s17 = sand.u32 1, %s1518_s20  }
  0x15   : > { %s1175_s18 = sshll.u32 %s1522_s21, 6  ;;  %s965_s24 = sshll.u32 %s205_s17, 6 }
  0x16   : > { %s212_s28 = scalar_lea.hbm %s2041_s3, %s1175_s18  ;;  %s207_s30 = scalar_lea.vmem [#allocation8], %s965_s24 }
  0x17   : > { %s213_s29 = sshll.u32 %s212_s28, 4  ;;  %s215_s6 = sshll.u32 %s207_s30, 4  ;;  %s214_s29 = int_to_ptr.hbm [resolvable:$true] %s213_s29  ;;  %s216_s6 = int_to_ptr.vmem [resolvable:$true] %s215_s6 }
  0x18   : > { %p1632_p0 = pnand %p1316_p12, %p97_p13  ;;  %s204_s10 = scalar_lea.sflag [#allocation4], %s203_s15 }
  0x19   : > { %s1418_s11 = sshra.s32 %s214_s29, 4  ;;  %s1425_s18 = scalar_lea.hbm %s2041_s3, 128  ;;  %s1419_s11 = int_to_ptr.hbm [resolvable:$true] %s1418_s11 }
  0x1a   : > { %s1420_s13 = scalar_lea.hbm %s1419_s11, 64  ;;  %p1422_p3 = pneg %p1632_p0 }
  0x1b   : > { %p1421_p2 = scmp.ne.s32.totalorder %s1419_s11, %s1420_s13  ;;  %p1426_p9 = scmp.lt.s32.totalorder %s1419_s11, %s2041_s3 }
  0x1c   : > { %p1427_p10 = scmp.lt.s32.totalorder %s1425_s18, %s1420_s13 }
  0x1d   : > { %p1423_p7 = pnand %p1422_p3, %p1421_p2 }
  0x1e   : > { %p1428_p11 = por %p1427_p10, %p1426_p9 }
  0x1f   : > { %p1424_p8 = pneg %p1423_p7 }
  0x21   : > { %p1429_p12 = pnand %p1428_p11, %p1424_p8 }
  0x23   : > { %1432 = shalt.err (!%p1429_p12)
}
  0x24   : > { %1313 = dma.hbm_to_vmem [thread:$0]  (!%p1632_p0), %s214_s29, 1024, %s216_s6, %s204_s10, %s1525_s8, %s1525_s8, %s1526_s9  }
  0x25   : > { %233 = sbr.rel (%p1594_p6) target bundleno = 999 (0x3e7), region = 40 }
  0x2a   : > { %1493 = dma.done.wait (%p102_p1), [#allocation4], 1024  }
  0x2b   : > { %1495 = vsyncadd (%p102_p1), [#allocation4], 4294966272 }
  0x2c   : > { %1497 = dma.done.wait (%p102_p1), [#allocation7], 1024  }
  0x2d   : > { %1499 = vsyncadd (%p102_p1), [#allocation7], 4294966272  ;;  %s245_s8 = sand.u32 1, %s1578_s22   ;;  %s247_s9 = sand.u32 1, %s1514_s19  }
  0x2e   : > { %s971_s27 = sshll.u32 %s247_s9, 6  ;;  %s246_s15 = scalar_lea.sflag [#allocation4], %s245_s8 }
  0x2f   : > { %s1663_s25 = scalar_lea.vmem [#allocation8], %s971_s27 }
  0x30   : > { %1501 = dma.done.wait (%p1587_p5), %s246_s15, 1024  }
  0x31   : > { %1503 = vsyncadd (%p1587_p5), %s246_s15, 4294966272  ;;  %p275_p6 = scmp.lt.s32.totalorder %s1578_s22, 1  ;;  %281 = sbr.rel (%p962_p4) target bundleno = 63 (0x3f), region = 56 }
  0x33   : > { %s1671_s26 = scalar_select %p275_p6, %s1578_s22, 1 }
  0x35   : > { %s277_s30 = scalar_lea.vmem %s2042_s4, %s1671_s26 }
  0x36   : > { %v282_v0 = vld [vmem:[#allocation6] sm:$0xff]   ;;  %v284_v1 = vld [vmem:[#allocation6 + $0x8] sm:$0xff]   ;;  %v286_v2 = vld [vmem:[#allocation6 + $0x10] sm:$0xff]  }
  0x37   : > { %299 = vst [vmem:[#allocation2 + $0x40] sm:$0xff] %v282_v0   ;;  %v288_v3 = vld [vmem:[#allocation6 + $0x18] sm:$0xff]   ;;  %v290_v4 = vld [vmem:[#allocation6 + $0x20] sm:$0xff]   ;;  %v292_v5 = vld [vmem:[#allocation6 + $0x28] sm:$0xff]  }
  0x38   : > { %301 = vst [vmem:[#allocation2 + $0x48] sm:$0xff] %v284_v1   ;;  %v294_v6 = vld [vmem:[#allocation6 + $0x30] sm:$0xff]   ;;  %v296_v7 = vld [vmem:[#allocation6 + $0x38] sm:$0xff]  }
  0x39   : > { %303 = vst [vmem:[#allocation2 + $0x50] sm:$0xff] %v286_v2  }
  0x3a   : > { %305 = vst [vmem:[#allocation2 + $0x58] sm:$0xff] %v288_v3  }
  0x3b   : > { %307 = vst [vmem:[#allocation2 + $0x60] sm:$0xff] %v290_v4  }
  0x3c   : > { %309 = vst [vmem:[#allocation2 + $0x68] sm:$0xff] %v292_v5  }
  0x3d   : > { %311 = vst [vmem:[#allocation2 + $0x70] sm:$0xff] %v294_v6  }
  0x3e   : > { %313 = vst [vmem:[#allocation2 + $0x78] sm:$0xff] %v296_v7  }
  0x3f PF: > { %v1679_v8 = vld [vmem:[#allocation3] sm:$0xf]  ;;  %v1683_v10 = vld [vmem:[#allocation3] sm:$0xf0]  ;;  %v1687_v12 = vld [vmem:[#allocation3 + $0x8] sm:$0xf] }
  0x40   : > { %2047 = vst [vmem:[#allocation14_spill] sm:$0xff] %v1679_v8  ;;  %v1681_v9 = vld [vmem:[#allocation3] sm:$0xf]  ;;  %v1685_v11 = vld [vmem:[#allocation3] sm:$0xf0]  ;;  %s331_s23 = sadd.s32 1, %s1578_s22 }
  0x41   : > { %2048 = vst [vmem:[#allocation15_spill] sm:$0xff] %v1683_v10  ;;  %v1689_v13 = vld [vmem:[#allocation3 + $0x8] sm:$0xf]  ;;  %v1691_v14 = vld [vmem:[#allocation3 + $0x8] sm:$0xf0]  ;;  %s332_s6 = sand.u32 1, %s331_s23 }
  0x42   : > { %2049 = vst [vmem:[#allocation16_spill] sm:$0xff] %v1687_v12  ;;  %v1693_v15 = vld [vmem:[#allocation3 + $0x8] sm:$0xf0]  ;;  %v1695_v16 = vld [vmem:[#allocation3 + $0x10] sm:$0xf]  ;;  %s1192_s7 = sshll.u32 %s332_s6, 6 }
  0x43   : > { %2050 = vst [vmem:[#allocation17_spill] sm:$0xff] %v1691_v14  ;;  %v1697_v17 = vld [vmem:[#allocation3 + $0x10] sm:$0xf]  ;;  %v1699_v18 = vld [vmem:[#allocation3 + $0x10] sm:$0xf0]  ;;  %s1762_s10 = scalar_lea.vmem [#allocation2], %s1192_s7 }
  0x44   : > { %2051 = vst [vmem:[#allocation18_spill] sm:$0xff] %v1695_v16  ;;  %v1701_v19 = vld [vmem:[#allocation3 + $0x10] sm:$0xf0]  ;;  %v1703_v20 = vld [vmem:[#allocation3 + $0x18] sm:$0xf]  ;;  %p975_p1 = scmp.ge.s32.totalorder %s1578_s22, 1 }
  0x45   : > { %2052 = vst [vmem:[#allocation19_spill] sm:$0xff] %v1699_v18  ;;  %v1705_v21 = vld [vmem:[#allocation3 + $0x18] sm:$0xf]  ;;  %v1707_v22 = vld [vmem:[#allocation3 + $0x18] sm:$0xf0]  ;;  %s1225_s14 = sshll.u32 (!%p975_p1), %s245_s8, 6 }
  0x46   : > { %2053 = vst [vmem:[#allocation20_spill] sm:$0xff] %v1703_v20  ;;  %v1709_v23 = vld [vmem:[#allocation3 + $0x18] sm:$0xf0]  ;;  %v1711_v24 = vld [vmem:[#allocation3 + $0x20] sm:$0xf]  ;;  %s1958_s17 = scalar_lea.vmem (!%p975_p1), [#allocation2], %s1225_s14 }
  0x47   : > { %2054 = vst [vmem:[#allocation21_spill] sm:$0xff] %v1707_v22  ;;  %v1713_v25 = vld [vmem:[#allocation3 + $0x20] sm:$0xf]  ;;  %v1715_v26 = vld [vmem:[#allocation3 + $0x20] sm:$0xf0] }
  0x48   : > { %2055 = vst [vmem:[#allocation22_spill] sm:$0xff] %v1711_v24  ;;  %v1717_v27 = vld [vmem:[#allocation3 + $0x20] sm:$0xf0]  ;;  %v1719_v28 = vld [vmem:[#allocation3 + $0x28] sm:$0xf] }
  0x49   : > { %2056 = vst [vmem:[#allocation23_spill] sm:$0xff] %v1715_v26  ;;  %v1721_v29 = vld [vmem:[#allocation3 + $0x28] sm:$0xf]  ;;  %v1723_v30 = vld [vmem:[#allocation3 + $0x28] sm:$0xf0] }
  0x4a   : > { %2057 = vst [vmem:[#allocation24_spill] sm:$0xff] %v1719_v28  ;;  %v1725_v31 = vld [vmem:[#allocation3 + $0x28] sm:$0xf0]  ;;  %v1727_v32 = vld [vmem:[#allocation3 + $0x30] sm:$0xf] }
  0x4b   : > { %2058 = vst [vmem:[#allocation25_spill] sm:$0xff] %v1723_v30  ;;  %v1729_v33 = vld [vmem:[#allocation3 + $0x30] sm:$0xf]  ;;  %v1731_v34 = vld [vmem:[#allocation3 + $0x30] sm:$0xf0] }
  0x4c   : > { %v1733_v35 = vld [vmem:[#allocation3 + $0x30] sm:$0xf0]  ;;  %v1735_v36 = vld [vmem:[#allocation3 + $0x38] sm:$0xf]  ;;  %v1739_v38 = vld [vmem:[#allocation3 + $0x38] sm:$0xf0] }
  0x4d   : > { %v1737_v37 = vld [vmem:[#allocation3 + $0x38] sm:$0xf]  ;;  %v1741_v39 = vld [vmem:[#allocation3 + $0x38] sm:$0xf0]  ;;  %v1745_v40 = vld [vmem:[%s1663_s25] sm:$0xf] }
  0x4e   : > { %2059 = vst [vmem:[#allocation26_spill] sm:$0xff] %v1745_v40  ;;  %v1748_v41 = vld [vmem:[%s1663_s25] sm:$0xf]  ;;  %v1751_v42 = vld [vmem:[%s1663_s25] sm:$0xf0] }
  0x4f   : > { %2060 = vst [vmem:[#allocation27_spill] sm:$0xff] %v1751_v42  ;;  %v1754_v43 = vld [vmem:[%s1663_s25] sm:$0xf0]  ;;  %v1757_v44 = vld [vmem:[%s1663_s25 + $0x8] sm:$0xf] }
  0x50   : > { %2061 = vst [vmem:[#allocation28_spill] sm:$0xff] %v1757_v44  ;;  %v1760_v45 = vld [vmem:[%s1663_s25 + $0x8] sm:$0xf]  ;;  %v1765_v46 = vld [vmem:[%s1762_s10] sm:$0xf] }
  0x51   : > { %2062 = vst [vmem:[#allocation29_spill] sm:$0xff] %v1765_v46  ;;  %v1768_v47 = vld [vmem:[%s1762_s10] sm:$0xf]  ;;  %v1771_v48 = vld [vmem:[%s1762_s10] sm:$0xf0] }
  0x52   : > { %2063 = vst [vmem:[#allocation30_spill] sm:$0xff] %v1771_v48  ;;  %v1774_v49 = vld [vmem:[%s1762_s10] sm:$0xf0]  ;;  %v1777_v50 = vld [vmem:[%s1762_s10 + $0x8] sm:$0xf] }
  0x53   : > { %2064 = vst [vmem:[#allocation31_spill] sm:$0xff] %v1777_v50  ;;  %v1780_v51 = vld [vmem:[%s1762_s10 + $0x8] sm:$0xf]  ;;  %v1783_v52 = vld [vmem:[%s1762_s10 + $0x8] sm:$0xf0] }
  0x54   : > { %2065 = vst [vmem:[#allocation32_spill] sm:$0xff] %v1783_v52  ;;  %v1786_v53 = vld [vmem:[%s1762_s10 + $0x8] sm:$0xf0]  ;;  %v1789_v54 = vld [vmem:[%s1762_s10 + $0x10] sm:$0xf] }
  0x55   : > { %2066 = vst [vmem:[#allocation33_spill] sm:$0xff] %v1789_v54  ;;  %v1792_v55 = vld [vmem:[%s1762_s10 + $0x10] sm:$0xf]  ;;  %v1795_v56 = vld [vmem:[%s1762_s10 + $0x10] sm:$0xf0] }
  0x56   : > { %2067 = vst [vmem:[#allocation34_spill] sm:$0xff] %v1795_v56  ;;  %v1798_v57 = vld [vmem:[%s1762_s10 + $0x10] sm:$0xf0]  ;;  %v1801_v58 = vld [vmem:[%s1762_s10 + $0x18] sm:$0xf] }
  0x57   : > { %2068 = vst [vmem:[#allocation35_spill] sm:$0xff] %v1801_v58  ;;  %v1804_v59 = vld [vmem:[%s1762_s10 + $0x18] sm:$0xf]  ;;  %v1807_v60 = vld [vmem:[%s1762_s10 + $0x18] sm:$0xf0] }
  0x58   : > { %2069 = vst [vmem:[#allocation36_spill] sm:$0xff] %v1807_v60  ;;  %v1810_v61 = vld [vmem:[%s1762_s10 + $0x18] sm:$0xf0]  ;;  %v1813_v62 = vld [vmem:[%s1762_s10 + $0x20] sm:$0xf] }
  0x59   : > { %2070 = vst [vmem:[#allocation37_spill] sm:$0xff] %v1813_v62  ;;  %v1816_v63 = vld [vmem:[%s1762_s10 + $0x20] sm:$0xf]  ;;  %v1819_v0 = vld [vmem:[%s1762_s10 + $0x20] sm:$0xf0] }
  0x5a   : > { %2071 = vst [vmem:[#allocation38_spill] sm:$0xff] %v1819_v0  ;;  %v1822_v1 = vld [vmem:[%s1762_s10 + $0x20] sm:$0xf0]  ;;  %v1825_v2 = vld [vmem:[%s1762_s10 + $0x28] sm:$0xf] }
  0x5b   : > { %2072 = vst [vmem:[#allocation39_spill] sm:$0xff] %v1825_v2  ;;  %v1828_v3 = vld [vmem:[%s1762_s10 + $0x28] sm:$0xf]  ;;  %v1831_v4 = vld [vmem:[%s1762_s10 + $0x28] sm:$0xf0] }
  0x5c   : > { %2073 = vst [vmem:[#allocation40_spill] sm:$0xff] %v1831_v4  ;;  %v1834_v5 = vld [vmem:[%s1762_s10 + $0x28] sm:$0xf0]  ;;  %v1837_v6 = vld [vmem:[%s1762_s10 + $0x30] sm:$0xf] }
  0x5d   : > { %v1840_v7 = vld [vmem:[%s1762_s10 + $0x30] sm:$0xf]  ;;  %v1843_v42 = vld [vmem:[%s1762_s10 + $0x30] sm:$0xf0]  ;;  %v1849_v44 = vld [vmem:[%s1762_s10 + $0x38] sm:$0xf] }
  0x5e   : > { %v1846_v40 = vld [vmem:[%s1762_s10 + $0x30] sm:$0xf0]  ;;  %v1852_v48 = vld [vmem:[%s1762_s10 + $0x38] sm:$0xf]  ;;  %v1855_v46 = vld [vmem:[%s1762_s10 + $0x38] sm:$0xf0] }
  0x5f   : > { %v1858_v10 = vld [vmem:[%s1762_s10 + $0x38] sm:$0xf0]  ;;  %v1861_v8 = vld [vmem:[%s1663_s25 + $0x8] sm:$0xf0]  ;;  %v1865_v50 = vld [vmem:[%s1663_s25 + $0x10] sm:$0xf] }
  0x60   : > { %2074 = vst [vmem:[#allocation41_spill] sm:$0xff] %v1861_v8  ;;  %v1212_v52 = vld [vmem:[%s1663_s25 + $0x8] sm:$0xf0]  ;;  %v1018_v14 = vld [vmem:[%s1663_s25 + $0x10] sm:$0xf] }
  0x61   : > { %2075 = vst [vmem:[#allocation42_spill] sm:$0xff] %v1865_v50  ;;  %v1869_v12 = vld [vmem:[%s1663_s25 + $0x10] sm:$0xf0]  ;;  %v1873_v54 = vld [vmem:[%s1663_s25 + $0x18] sm:$0xf] }
  0x62   : > { %2076 = vst [vmem:[#allocation43_spill] sm:$0xff] %v1869_v12  ;;  %v1214_v56 = vld [vmem:[%s1663_s25 + $0x10] sm:$0xf0]  ;;  %v1022_v18 = vld [vmem:[%s1663_s25 + $0x18] sm:$0xf] }
  0x63   : > { %2077 = vst [vmem:[#allocation44_spill] sm:$0xff] %v1873_v54  ;;  %v1877_v16 = vld [vmem:[%s1663_s25 + $0x18] sm:$0xf0]  ;;  %v1881_v60 = vld [vmem:[%s1663_s25 + $0x20] sm:$0xf] }
  0x64   : > { %2078 = vst [vmem:[#allocation45_spill] sm:$0xff] %v1877_v16  ;;  %v1216_v8 = vld [vmem:[%s1663_s25 + $0x18] sm:$0xf0]  ;;  %v1026_v50 = vld [vmem:[%s1663_s25 + $0x20] sm:$0xf] }
  0x65   : > { %2079 = vst [vmem:[#allocation46_spill] sm:$0xff] %v1881_v60  ;;  %v1885_v58 = vld [vmem:[%s1663_s25 + $0x20] sm:$0xf0]  ;;  %v1889_v22 = vld [vmem:[%s1663_s25 + $0x28] sm:$0xf] }
  0x66   : > { %2080 = vst [vmem:[#allocation47_spill] sm:$0xff] %v1885_v58  ;;  %v1218_v12 = vld [vmem:[%s1663_s25 + $0x20] sm:$0xf0]  ;;  %v1030_v20 = vld [vmem:[%s1663_s25 + $0x28] sm:$0xf] }
  0x67   : > { %2081 = vst [vmem:[#allocation48_spill] sm:$0xff] %v1889_v22  ;;  %v1893_v0 = vld [vmem:[%s1663_s25 + $0x28] sm:$0xf0]  ;;  %v1897_v62 = vld [vmem:[%s1663_s25 + $0x30] sm:$0xf] }
  0x68   : > { %2082 = vst [vmem:[#allocation49_spill] sm:$0xff] %v1893_v0  ;;  %v1220_v54 = vld [vmem:[%s1663_s25 + $0x28] sm:$0xf0]  ;;  %v1034_v26 = vld [vmem:[%s1663_s25 + $0x30] sm:$0xf]  ;;  %372 = sbr.rel (%p975_p1) target bundleno = 558 (0x22e), region = 60 }
  0x69   : > { %2083 = vst [vmem:[#allocation50_spill] sm:$0xff] %v1897_v62  ;;  %v1901_v16 = vld [vmem:[%s1663_s25 + $0x30] sm:$0xf0]  ;;  %v1905_v4 = vld [vmem:[%s1663_s25 + $0x38] sm:$0xf] }
  0x6a   : > { %2084 = vst [vmem:[#allocation51_spill] sm:$0xff] %v1901_v16  ;;  %v1222_v24 = vld [vmem:[%s1663_s25 + $0x30] sm:$0xf0]  ;;  %v1038_v60 = vld [vmem:[%s1663_s25 + $0x38] sm:$0xf] }
  0x6b   : > { %2085 = vst [vmem:[#allocation52_spill] sm:$0xff] %v1905_v4  ;;  %v1909_v2 = vld [vmem:[%s1663_s25 + $0x38] sm:$0xf0]  ;;  %v1917_v58 = vld [vmem:[%s277_s30] sm:$0x1] }
  0x6c   : > { %2086 = vst [vmem:[#allocation53_spill] sm:$0xff] %v1909_v2  ;;  %v1224_v30 = vld [vmem:[%s1663_s25 + $0x38] sm:$0xf0] }
  0x6d   : > { %v1039_v0 = vor.u32 %v1224_v30, %v1038_v60  ;;  %v1035_v22 = vor.u32 %v1222_v24, %v1034_v26  ;;  %v1031_v16 = vor.u32 %v1220_v54, %v1030_v20  ;;  %v1027_v62 = vor.u32 %v1218_v12, %v1026_v50 }
  0x6e   : > { %v1023_v2 = vor.u32 %v1216_v8, %v1022_v18  ;;  %v1019_v4 = vor.u32 %v1214_v56, %v1018_v14  ;;  %v1015_v28 = vor.u32 %v1212_v52, %v1760_v45  ;;  %v1011_v24 = vor.u32 %v1754_v43, %v1748_v41 }
  0x6f   : > { %1273 = vmatpush.bf16.msra.mxu2 %v1039_v0  ;;  %469 = vmatpush.bf16.msra.mxu0 %v1039_v0  ;;  %v995_v20 = vor.u32 %v1822_v1, %v1816_v63  ;;  %v979_v12 = vor.u32 %v1774_v49, %v1768_v47  ;;  %v999_v8 = vor.u32 %v1834_v5, %v1828_v3 }
  0x70   : > { %v983_v14 = vor.u32 %v1786_v53, %v1780_v51  ;;  %v987_v18 = vor.u32 %v1798_v57, %v1792_v55  ;;  %v991_v26 = vor.u32 %v1810_v61, %v1804_v59  ;;  %v1043_v1 = vor.u32 %v1685_v11, %v1681_v9 }
  0x71   : > { %v1047_v3 = vor.u32 %v1693_v15, %v1689_v13  ;;  %v1051_v5 = vor.u32 %v1701_v19, %v1697_v17  ;;  %v1067_v9 = vor.u32 %v1733_v35, %v1729_v33  ;;  %v1055_v11 = vor.u32 %v1709_v23, %v1705_v21 }
  0x72   : > { %v1071_v13 = vor.u32 %v1741_v39, %v1737_v37 }
  0x73   : > { %1274 = vmatpush.bf16.msra.mxu2 %v1035_v22  ;;  %470 = vmatpush.bf16.msra.mxu0 %v1035_v22  ;;  %v1007_v22 = vor.u32 %v1858_v10, %v1852_v48 }
  0x77   : > { %1275 = vmatpush.bf16.msra.mxu2 %v1031_v16  ;;  %471 = vmatpush.bf16.msra.mxu0 %v1031_v16  ;;  %v1003_v16 = vor.u32 %v1846_v40, %v1840_v7 }
  0x7b   : > { %1276 = vmatpush.bf16.msra.mxu2 %v1027_v62  ;;  %472 = vmatpush.bf16.msra.mxu0 %v1027_v62 }
  0x7f   : > { %1277 = vmatpush.bf16.msra.mxu2 %v1023_v2  ;;  %473 = vmatpush.bf16.msra.mxu0 %v1023_v2  ;;  %v1059_v2 = vor.u32 %v1717_v27, %v1713_v25  ;;  %v527_v25 = vperm.slane %v1917_v58, 0 }
  0x83   : > { %1278 = vmatpush.bf16.msra.mxu2 %v1019_v4  ;;  %474 = vmatpush.bf16.msra.mxu0 %v1019_v4  ;;  %v1063_v4 = vor.u32 %v1725_v31, %v1721_v29 }
  0x87   : > { %1279 = vmatpush.bf16.msra.mxu2 %v1015_v28  ;;  %475 = vmatpush.bf16.msra.mxu0 %v1015_v28 }
  0x8b   : > { %1280 = vmatpush.bf16.msra.mxu2 %v1011_v24  ;;  %476 = vmatpush.bf16.msra.mxu0 %v1011_v24 }
  0x8e   : > { %497 = vmatmul.bf16.vlgmr.msra.gmra.mxu2 %v995_v20  ;;  %477 = vmatmul.bf16.vlgmr.msra.gmra.mxu0 %v979_v12 }
  0x9e   : > { %502 = vmatmul.bf16.gmra.mxu2 %v999_v8  ;;  %482 = vmatmul.bf16.gmra.mxu0 %v983_v14 }
  0xae   : > { %507 = vmatmul.bf16.gmra.mxu2 %v1003_v16  ;;  %487 = vmatmul.bf16.gmra.mxu0 %v987_v18 }
  0xbe   : > { %512 = vmatmul.bf16.gmra.mxu2 %v1007_v22  ;;  %492 = vmatmul.bf16.gmra.mxu0 %v991_v26 }
 0x10b   : > { %v478_v30 = vpop.f32.mrf.mxu0 }
 0x111   : > { %v498_v28 = vpop.f32.mrf.mxu2 }
 0x113   : > { %v480_v43 = vpop.f32.mrf.mxu0 }
 0x114   : > { %v518_v0 = vpack.c.bf16 %v480_v43, %v478_v30 }
 0x119   : > { %v500_v41 = vpop.f32.mrf.mxu2 }
 0x11a   : > { %v522_v59 = vpack.c.bf16 %v500_v41, %v498_v28 }
 0x11b   : > { %v483_v47 = vpop.f32.mrf.mxu0 }
 0x121   : > { %v503_v45 = vpop.f32.mrf.mxu2 }
 0x123   : > { %v485_v49 = vpop.f32.mrf.mxu0 }
 0x124   : > { %v519_v63 = vpack.c.bf16 %v485_v49, %v483_v47 }
 0x129   : > { %v505_v40 = vpop.f32.mrf.mxu2 }
 0x12a   : > { %v523_v57 = vpack.c.bf16 %v505_v40, %v503_v45 }
 0x12b   : > { %v488_v51 = vpop.f32.mrf.mxu0 }
 0x131   : > { %v508_v50 = vpop.f32.mrf.mxu2 }
 0x133   : > { %v490_v54 = vpop.f32.mrf.mxu0 }
 0x134   : > { %v520_v62 = vpack.c.bf16 %v490_v54, %v488_v51 }
 0x139   : > { %v510_v52 = vpop.f32.mrf.mxu2 }
 0x13a   : > { %v524_v56 = vpack.c.bf16 %v510_v52, %v508_v50 }
 0x13b   : > { %v493_v48 = vpop.f32.mrf.mxu0 }
 0x141   : > { %v513_v53 = vpop.f32.mrf.mxu2 }
 0x143   : > { %v495_v60 = vpop.f32.mrf.mxu0 }
 0x144   : > { %v521_v61 = vpack.c.bf16 %v495_v60, %v493_v48 }
 0x149   : > { %v515_v55 = vpop.f32.mrf.mxu2 }
 0x14a   : > { %v525_v10 = vpack.c.bf16 %v515_v55, %v513_v53 }
 0x14c   : > { %577 = vmatpush.bf16.msra.mxu1 %v525_v10  ;;  %1281 = vmatpush.bf16.msra.mxu3 %v525_v10 }
 0x150   : > { %578 = vmatpush.bf16.msra.mxu1 %v524_v56  ;;  %1282 = vmatpush.bf16.msra.mxu3 %v524_v56 }
 0x154   : > { %579 = vmatpush.bf16.msra.mxu1 %v523_v57  ;;  %1283 = vmatpush.bf16.msra.mxu3 %v523_v57 }
 0x158   : > { %580 = vmatpush.bf16.msra.mxu1 %v522_v59  ;;  %1284 = vmatpush.bf16.msra.mxu3 %v522_v59 }
 0x15c   : > { %581 = vmatpush.bf16.msra.mxu1 %v521_v61  ;;  %1285 = vmatpush.bf16.msra.mxu3 %v521_v61 }
 0x160   : > { %582 = vmatpush.bf16.msra.mxu1 %v520_v62  ;;  %1286 = vmatpush.bf16.msra.mxu3 %v520_v62 }
 0x164   : > { %583 = vmatpush.bf16.msra.mxu1 %v519_v63  ;;  %1287 = vmatpush.bf16.msra.mxu3 %v519_v63 }
 0x168   : > { %584 = vmatpush.bf16.msra.mxu1 %v518_v0  ;;  %1288 = vmatpush.bf16.msra.mxu3 %v518_v0 }
 0x16b   : > { %585 = vmatmul.bf16.vlgmr.msra.gmra.mxu1 %v1043_v1  ;;  %605 = vmatmul.bf16.vlgmr.msra.gmra.mxu3 %v1059_v2 }
 0x17b   : > { %590 = vmatmul.bf16.gmra.mxu1 %v1047_v3  ;;  %610 = vmatmul.bf16.gmra.mxu3 %v1063_v4 }
 0x18b   : > { %595 = vmatmul.bf16.gmra.mxu1 %v1051_v5  ;;  %615 = vmatmul.bf16.gmra.mxu3 %v1067_v9 }
 0x19b   : > { %600 = vmatmul.bf16.gmra.mxu1 %v1055_v11  ;;  %620 = vmatmul.bf16.gmra.mxu3 %v1071_v13 }
 0x1e8   : > { %v586_v15 = vpop.f32.mrf.mxu1 }
 0x1e9   : > { %v587_v29 = vadd.f32 %v586_v15, %v527_v25 }
 0x1eb   : > { %v626_v19 = vmax.f32 %v587_v29, 0.0 }
 0x1ee   : > { %v606_v27 = vpop.f32.mrf.mxu3 }
 0x1ef   : > { %v607_v35 = vadd.f32 %v606_v27, %v527_v25 }
 0x1f0   : > { %v588_v31 = vpop.f32.mrf.mxu1 }
 0x1f1   : > { %v589_v17 = vadd.f32 %v588_v31, %v527_v25  ;;  %v634_v37 = vmax.f32 %v607_v35, 0.0 }
 0x1f3   : > { %v627_v33 = vmax.f32 %v589_v17, 0.0 }
 0x1f5   : > { %v1229_v7 = vpack.c.bf16 %v627_v33, %v626_v19 }
 0x1f6   : > { %v608_v24 = vpop.f32.mrf.mxu3 }
 0x1f7   : > { %1230 = vst [vmem:[%s1958_s17] sm:$0xff] %v1229_v7   ;;  %v609_v21 = vadd.f32 %v608_v24, %v527_v25 }
 0x1f8   : > { %v591_v23 = vpop.f32.mrf.mxu1 }
 0x1f9   : > { %v635_v39 = vmax.f32 %v609_v21, 0.0  ;;  %v592_v8 = vadd.f32 %v591_v23, %v527_v25 }
 0x1fb   : > { %v1249_v20 = vpack.c.bf16 %v635_v39, %v634_v37  ;;  %v628_v18 = vmax.f32 %v592_v8, 0.0 }
 0x1fd   : > { %1269 = vst [vmem:[%s1958_s17 + $0x20] sm:$0xff] %v1249_v20  }
 0x1fe   : > { %v611_v12 = vpop.f32.mrf.mxu3 }
 0x1ff   : > { %v612_v26 = vadd.f32 %v611_v12, %v527_v25 }
 0x200   : > { %v593_v14 = vpop.f32.mrf.mxu1 }
 0x201   : > { %v594_v16 = vadd.f32 %v593_v14, %v527_v25  ;;  %v636_v45 = vmax.f32 %v612_v26, 0.0 }
 0x203   : > { %v629_v22 = vmax.f32 %v594_v16, 0.0 }
 0x205   : > { %v1234_v28 = vpack.c.bf16 %v629_v22, %v628_v18 }
 0x206   : > { %v613_v30 = vpop.f32.mrf.mxu3 }
 0x207   : > { %1266 = vst [vmem:[%s1958_s17 + $0x8] sm:$0xff] %v1234_v28   ;;  %v614_v41 = vadd.f32 %v613_v30, %v527_v25 }
 0x208   : > { %v596_v43 = vpop.f32.mrf.mxu1 }
 0x209   : > { %v637_v47 = vmax.f32 %v614_v41, 0.0  ;;  %v597_v50 = vadd.f32 %v596_v43, %v527_v25 }
 0x20b   : > { %v1254_v40 = vpack.c.bf16 %v637_v47, %v636_v45  ;;  %v630_v53 = vmax.f32 %v597_v50, 0.0 }
 0x20d   : > { %1270 = vst [vmem:[%s1958_s17 + $0x28] sm:$0xff] %v1254_v40  }
 0x20e   : > { %v616_v49 = vpop.f32.mrf.mxu3 }
 0x20f   : > { %v617_v55 = vadd.f32 %v616_v49, %v527_v25 }
 0x210   : > { %v598_v51 = vpop.f32.mrf.mxu1 }
 0x211   : > { %v599_v52 = vadd.f32 %v598_v51, %v527_v25  ;;  %v638_v59 = vmax.f32 %v617_v55, 0.0 }
 0x213   : > { %v631_v54 = vmax.f32 %v599_v52, 0.0 }
 0x215   : > { %v1239_v10 = vpack.c.bf16 %v631_v54, %v630_v53 }
 0x216   : > { %v618_v48 = vpop.f32.mrf.mxu3 }
 0x217   : > { %1267 = vst [vmem:[%s1958_s17 + $0x10] sm:$0xff] %v1239_v10   ;;  %v619_v56 = vadd.f32 %v618_v48, %v527_v25 }
 0x218   : > { %v601_v57 = vpop.f32.mrf.mxu1 }
 0x219   : > { %v639_v60 = vmax.f32 %v619_v56, 0.0  ;;  %v602_v63 = vadd.f32 %v601_v57, %v527_v25 }
 0x21b   : > { %v1259_v61 = vpack.c.bf16 %v639_v60, %v638_v59  ;;  %v632_v2 = vmax.f32 %v602_v63, 0.0 }
 0x21d   : > { %1271 = vst [vmem:[%s1958_s17 + $0x30] sm:$0xff] %v1259_v61  }
 0x21e   : > { %v621_v62 = vpop.f32.mrf.mxu3 }
 0x21f   : > { %v622_v4 = vadd.f32 %v621_v62, %v527_v25 }
 0x220   : > { %v603_v0 = vpop.f32.mrf.mxu1 }
 0x221   : > { %v604_v1 = vadd.f32 %v603_v0, %v527_v25  ;;  %v640_v13 = vmax.f32 %v622_v4, 0.0 }
 0x223   : > { %v633_v3 = vmax.f32 %v604_v1, 0.0 }
 0x225   : > { %v1244_v5 = vpack.c.bf16 %v633_v3, %v632_v2 }
 0x226   : > { %v623_v9 = vpop.f32.mrf.mxu3 }
 0x227   : > { %1268 = vst [vmem:[%s1958_s17 + $0x18] sm:$0xff] %v1244_v5   ;;  %v624_v11 = vadd.f32 %v623_v9, %v527_v25 }
 0x229   : > { %v641_v15 = vmax.f32 %v624_v11, 0.0 }
 0x22b   : > { %v1264_v27 = vpack.c.bf16 %v641_v15, %v640_v13 }
 0x22d   : > { %1272 = vst [vmem:[%s1958_s17 + $0x38] sm:$0xff] %v1264_v27  }
 0x22e PF: > { %p1074_p4 = scmp.ne.s32.totalorder %s1578_s22, 1 }
 0x230   : > { %681 = sbr.rel (%p1074_p4) target bundleno = 994 (0x3e2), region = 64 }
 0x235   : > { %v1106_v29 = vor.u32 %v1739_v38, %v1735_v36  ;;  %v1102_v31 = vor.u32 %v1731_v34, %v1727_v32  ;;  %v1138_v17 = vor.u32 %v1855_v46, %v1849_v44  ;;  %v1134_v25 = vor.u32 %v1843_v42, %v1837_v6  ;;  %v2087_v19 = vld [vmem:[#allocation24_spill] sm:$0xff]  ;;  %v2088_v33 = vld [vmem:[#allocation25_spill] sm:$0xff]  ;;  %v2089_v7 = vld [vmem:[#allocation39_spill] sm:$0xff] }
 0x236   : > { %v1098_v35 = vor.u32 %v2088_v33, %v2087_v19  ;;  %v2090_v24 = vld [vmem:[#allocation40_spill] sm:$0xff]  ;;  %v2091_v36 = vld [vmem:[#allocation22_spill] sm:$0xff]  ;;  %v2092_v38 = vld [vmem:[#allocation23_spill] sm:$0xff] }
 0x237   : > { %731 = vmatpush.bf16.msra.mxu0 %v1106_v29  ;;  %793 = vmatpush.bf16.msra.mxu1 %v1138_v17  ;;  %v1130_v21 = vor.u32 %v2090_v24, %v2089_v7  ;;  %v1094_v23 = vor.u32 %v2092_v38, %v2091_v36  ;;  %v2093_v32 = vld [vmem:[#allocation37_spill] sm:$0xff]  ;;  %v2094_v34 = vld [vmem:[#allocation38_spill] sm:$0xff]  ;;  %v2095_v46 = vld [vmem:[#allocation20_spill] sm:$0xff] }
 0x238   : > { %v1126_v44 = vor.u32 %v2094_v34, %v2093_v32  ;;  %v2096_v37 = vld [vmem:[#allocation21_spill] sm:$0xff]  ;;  %v2097_v6 = vld [vmem:[#allocation35_spill] sm:$0xff]  ;;  %v2098_v39 = vld [vmem:[#allocation36_spill] sm:$0xff] }
 0x239   : > { %v1090_v42 = vor.u32 %v2096_v37, %v2095_v46  ;;  %v1122_v20 = vor.u32 %v2098_v39, %v2097_v6  ;;  %v2099_v12 = vld [vmem:[#allocation18_spill] sm:$0xff]  ;;  %v2100_v8 = vld [vmem:[#allocation19_spill] sm:$0xff]  ;;  %v2101_v16 = vld [vmem:[#allocation33_spill] sm:$0xff] }
 0x23a   : > { %v1086_v14 = vor.u32 %v2100_v8, %v2099_v12  ;;  %v2102_v18 = vld [vmem:[#allocation34_spill] sm:$0xff]  ;;  %v2103_v26 = vld [vmem:[#allocation16_spill] sm:$0xff]  ;;  %v2104_v28 = vld [vmem:[#allocation17_spill] sm:$0xff] }
 0x23b   : > { %732 = vmatpush.bf16.msra.mxu0 %v1102_v31  ;;  %794 = vmatpush.bf16.msra.mxu1 %v1134_v25  ;;  %v1118_v22 = vor.u32 %v2102_v18, %v2101_v16  ;;  %v1082_v30 = vor.u32 %v2104_v28, %v2103_v26  ;;  %v2105_v41 = vld [vmem:[#allocation31_spill] sm:$0xff]  ;;  %v2106_v43 = vld [vmem:[#allocation32_spill] sm:$0xff]  ;;  %v2107_v47 = vld [vmem:[#allocation14_spill] sm:$0xff] }
 0x23c   : > { %v1114_v45 = vor.u32 %v2106_v43, %v2105_v41  ;;  %v2108_v40 = vld [vmem:[#allocation15_spill] sm:$0xff]  ;;  %v682_v50 = vld [vmem:[%s2040_s2] sm:$0x1]  ;;  %v2110_v52 = vld [vmem:[#allocation30_spill] sm:$0xff] }
 0x23d   : > { %v1078_v49 = vor.u32 %v2108_v40, %v2107_v47  ;;  %v2109_v51 = vld [vmem:[#allocation29_spill] sm:$0xff]  ;;  %v2111_v54 = vld [vmem:[#allocation52_spill] sm:$0xff]  ;;  %v2113_v48 = vld [vmem:[#allocation50_spill] sm:$0xff] }
 0x23e   : > { %v1110_v53 = vor.u32 %v2110_v52, %v2109_v51  ;;  %v2112_v55 = vld [vmem:[#allocation53_spill] sm:$0xff]  ;;  %v2114_v56 = vld [vmem:[#allocation51_spill] sm:$0xff]  ;;  %v2115_v59 = vld [vmem:[#allocation48_spill] sm:$0xff] }
 0x23f   : > { %733 = vmatpush.bf16.msra.mxu0 %v1098_v35  ;;  %795 = vmatpush.bf16.msra.mxu1 %v1130_v21  ;;  %v1170_v10 = vor.u32 %v2112_v55, %v2111_v54  ;;  %v1166_v57 = vor.u32 %v2114_v56, %v2113_v48  ;;  %v2116_v60 = vld [vmem:[#allocation49_spill] sm:$0xff]  ;;  %v2117_v62 = vld [vmem:[#allocation46_spill] sm:$0xff]  ;;  %v2118_v63 = vld [vmem:[#allocation47_spill] sm:$0xff] }
 0x240   : > { %v1162_v61 = vor.u32 %v2116_v60, %v2115_v59  ;;  %v1158_v0 = vor.u32 %v2118_v63, %v2117_v62  ;;  %v2119_v1 = vld [vmem:[#allocation44_spill] sm:$0xff]  ;;  %v2120_v2 = vld [vmem:[#allocation45_spill] sm:$0xff]  ;;  %v2121_v4 = vld [vmem:[#allocation42_spill] sm:$0xff] }
 0x241   : > { %855 = vmatpush.bf16.msra.mxu2 %v1170_v10  ;;  %v1154_v3 = vor.u32 %v2120_v2, %v2119_v1  ;;  %v2122_v5 = vld [vmem:[#allocation43_spill] sm:$0xff]  ;;  %v2123_v11 = vld [vmem:[#allocation28_spill] sm:$0xff]  ;;  %v2124_v13 = vld [vmem:[#allocation41_spill] sm:$0xff] }
 0x242   : > { %v1150_v9 = vor.u32 %v2122_v5, %v2121_v4  ;;  %v1146_v15 = vor.u32 %v2124_v13, %v2123_v11  ;;  %v2125_v17 = vld [vmem:[#allocation26_spill] sm:$0xff]  ;;  %v2126_v25 = vld [vmem:[#allocation27_spill] sm:$0xff] }
 0x243   : > { %734 = vmatpush.bf16.msra.mxu0 %v1094_v23  ;;  %796 = vmatpush.bf16.msra.mxu1 %v1126_v44  ;;  %v1142_v19 = vor.u32 %v2126_v25, %v2125_v17 }
 0x245   : > { %856 = vmatpush.bf16.msra.mxu2 %v1166_v57 }
 0x247   : > { %735 = vmatpush.bf16.msra.mxu0 %v1090_v42  ;;  %797 = vmatpush.bf16.msra.mxu1 %v1122_v20 }
 0x249   : > { %857 = vmatpush.bf16.msra.mxu2 %v1162_v61 }
 0x24b   : > { %736 = vmatpush.bf16.msra.mxu0 %v1086_v14  ;;  %798 = vmatpush.bf16.msra.mxu1 %v1118_v22 }
 0x24d   : > { %858 = vmatpush.bf16.msra.mxu2 %v1158_v0 }
 0x24f   : > { %737 = vmatpush.bf16.msra.mxu0 %v1082_v30  ;;  %799 = vmatpush.bf16.msra.mxu1 %v1114_v45 }
 0x251   : > { %859 = vmatpush.bf16.msra.mxu2 %v1154_v3 }
 0x253   : > { %738 = vmatpush.bf16.msra.mxu0 %v1078_v49  ;;  %800 = vmatpush.bf16.msra.mxu1 %v1110_v53 }
 0x255   : > { %860 = vmatpush.bf16.msra.mxu2 %v1150_v9 }
 0x256   : > { %739 = vmatmul.bf16.vlgmr.msra.gmra.mxu0 %v682_v50 }
 0x259   : > { %861 = vmatpush.bf16.msra.mxu2 %v1146_v15 }
 0x25d   : > { %862 = vmatpush.bf16.msra.mxu2 %v1142_v19 }
 0x2d3   : > { %v740_v27 = vpop.f32.mrf.mxu0 }
 0x2d4   : > { %v744_v29 = vpack.c.bf16 %v740_v27, %v740_v27 }
 0x2d6   : > { %801 = vmatmul.bf16.vlgmr.msra.gmra.mxu1 %v744_v29 }
 0x2db   : > { %v742_v31 = vpop.f32.mrf.mxu0 }
 0x353   : > { %v802_v33 = vpop.f32.mrf.mxu1 }
 0x354   : > { %v806_v35 = vpack.c.bf16 %v802_v33, %v802_v33 }
 0x356   : > { %863 = vmatmul.bf16.vlgmr.msra.gmra.mxu2 %v806_v35 }
 0x35b   : > { %v804_v7 = vpop.f32.mrf.mxu1 }
 0x3d9   : > { %v864_v24 = vpop.f32.mrf.mxu2 }
 0x3da   : > { %v865_v21 = vadd.f32 %v864_v24, %v1917_v58 }
 0x3dc   : > { %868 = vst [vmem:[#allocation9] sm:$0x1] %v865_v21 }
 0x3e1   : > { %v866_v36 = vpop.f32.mrf.mxu2 }
 0x3e2 PF: > { %p1319_p5 = scmp.eq.s32.totalorder %s1578_s22, 1  ;;  %s1528_s21 = smov [#allocation9]  }
 0x3e3   : > { %s875_s8 = sshll.u32 %s1528_s21, 4  ;;  %s877_s15 = sshll.u32 %s2043_s5, 4  ;;  %s876_s8 = int_to_ptr.vmem [resolvable:$true] %s875_s8  ;;  %s878_s15 = int_to_ptr.hbm [resolvable:$true] %s877_s15 }
 0x3e4   : > { %1300 = dma.vmem_to_hbm [thread:$0]  (%p1319_p5), %s876_s8, 16, %s878_s15, [#allocation5]  }
 0x3e5   : > { %1505 = dma.done.wait (%p1319_p5), [#allocation5], 16  }
 0x3e6   : > { %1507 = vsyncadd (%p1319_p5), [#allocation5], 4294967280 }
 0x3e7 PF: > { %p15_p13 = scmp.ge.s32.totalorder %s1612_s12, 4   ;;  %s2127_s18 = smov %s1514_s19 }
 0x3e8   : > { %s2128_s19 = smov %s1518_s20  ;;  %s2129_s20 = smov %s1623_s16 }
 0x3e9   : > { %s2130_s21 = smov %s1612_s12  ;;  %17 = sbr.rel (!%p15_p13) target bundleno = 4 (0x4), region = 102 }
 0x3ee   :  { %891 = vsyncpa [#allocation4], 1 }
 0x3ef   :  { %893 = vsyncpa [#allocation4 + $0x1], 1 }
 0x3f0   :  { %894 = vsyncpa [#allocation7], 1 }
 0x3f1   :  { %895 = vsyncpa [#allocation5], 1 }
 0x3f2   :  { %897 = vsyncpa [#allocation5 + $0x1], 1 }

</bundles_post_ra>
